<compile_context>
chip_gen: v7x
topology: tpu7x:2x2x1
jax: 0.10.0
libtpu: 0.0.40
codegen_flags: <defaults>
</compile_context>

<pallas_src>
import functools

import jax
import jax.numpy as jnp
from jax.experimental import pallas as pl
from jax.experimental.pallas import tpu as pltpu

_LANES = 128
_ALIGN = 8 * _LANES                       # 1024-element layout quantum
_TARGET_PIPELINE_BYTES = 8 * 1024 * 1024  # 2 inputs x 2 buffers x ~2 MiB blocks
_VMEM_LIMIT_BYTES = 32 * 1024 * 1024      # safe on v5e (128 MiB) and v7x (64 MiB)


def _num_tensorcores() -> int:
    """Best-effort TensorCore count for the 'parallel' grid axis.

    Correctness never depends on this (masking handles any split); it only
    controls whether we shard the reduction across two cores.
    """
    try:
        dev = jax.devices()[0]
    except Exception:
        return 1
    for attr in ("num_cores", "core_count"):
        n = getattr(dev, attr, None)
        if isinstance(n, int) and 1 <= n <= 8:
            return n
    kind = (getattr(dev, "device_kind", "") or "").lower()
    # Single-TensorCore generations: v5e / v6e (Trillium).
    if any(s in kind for s in ("v5e", "v5 lite", "v5lite", "v6e", "v6 lite", "v6lite")):
        return 1
    # Dual-TensorCore (megacore) generations: v4, v5p, v7x.
    if any(s in kind for s in ("v4", "v5p", "v7")):
        return 2
    return 1


def _sumsq_kernel(yhat_ref, y_ref, out_ref, acc_ref, *,
                  tile_m, rows, blocks_per_core, needs_mask):
    """Accumulates sum((yhat - y)^2) for this core's slice of row-tiles."""
    j = pl.program_id(1)

    @pl.when(j == 0)
    def _():
        acc_ref[...] = jnp.zeros_like(acc_ref)

    # Upcast per-tile in VMEM (free on the VPU; keeps HBM traffic native-width).
    d = yhat_ref[...].astype(jnp.float32) - y_ref[...].astype(jnp.float32)

    if needs_mask:
        # Mask rows past the logical end of the data (ragged last block and/or
        # duplicated clamped blocks).  Static Python branch: compiled out
        # entirely when the tiling covers the array exactly.
        p = pl.program_id(0)
        logical_block = p * blocks_per_core + j
        row0 = logical_block * tile_m
        local_row = jax.lax.broadcasted_iota(jnp.int32, (tile_m, 1), 0)
        d = jnp.where((row0 + local_row) < rows, d, jnp.float32(0.0))

    sq = d * d
    # Fold (tile_m, 128) -> (tile_m//8, 8, 128) and accumulate elementwise into
    # the (8, 128) vector accumulator: pure VPU work, no per-step XLU reduce.
    acc_ref[...] += sq.reshape(tile_m // 8, 8, _LANES).sum(axis=0)

    @pl.when(j == pl.num_programs(1) - 1)
    def _():
        # Single cross-lane reduce at the very end of this core's slice.
        out_ref[0, 0] = jnp.sum(acc_ref[...])


def rmse_loss(yhat: jax.Array, y: jax.Array, eps: float = 1e-6) -> jax.Array:
    """Pallas TPU implementation of RMSELoss.forward(yhat, y)."""
    assert yhat.shape == y.shape, "yhat and y must have the same shape"
    total = int(yhat.size)
    if total == 0:
        # torch's MSELoss on empty tensors yields NaN; mirror that.
        return jnp.sqrt(jnp.float32(float("nan")))

    # Flatten in C order (same element order as PyTorch); keep native dtype.
    yh = jnp.ravel(yhat)
    yy = jnp.ravel(y)

    padded = ((total + _ALIGN - 1) // _ALIGN) * _ALIGN
    pad = padded - total
    if pad:
        # TODO(synk): jnp.pad materializes a full copy of both inputs; for
        # totals not divisible by 1024 a fused in-kernel tail path would avoid
        # this.  Zeros contribute nothing and are also masked in-kernel.
        yh = jnp.pad(yh, (0, pad))
        yy = jnp.pad(yy, (0, pad))

    rows = padded // _LANES                 # multiple of 8
    yh2 = yh.reshape(rows, _LANES)
    yy2 = yy.reshape(rows, _LANES)

    # Dtype-scaled tile: keep ~8 MiB of pipelined input buffers per core
    # (2 inputs x 2 pipeline buffers) regardless of element width, so per-step
    # DMA time stays well above the ~0.35 us grid-step overhead on every chip.
    bytes_per_row = _LANES * (jnp.dtype(yh2.dtype).itemsize
                              + jnp.dtype(yy2.dtype).itemsize)
    tile_target = _TARGET_PIPELINE_BYTES // (2 * bytes_per_row)
    tile_target = max(32, (tile_target // 32) * 32)   # multiple of every pack
    tile_m = min(tile_target, rows)

    n_blocks = -(-rows // tile_m)
    n_cores = _num_tensorcores()
    n_par = n_cores if n_blocks >= n_cores else 1
    blocks_per_core = -(-n_blocks // n_par)
    needs_clamp = (n_par * blocks_per_core) != n_blocks
    needs_mask = (n_par * blocks_per_core * tile_m) != rows

    if needs_clamp:
        def in_map(p, j):
            # Clamp so the overhang block never indexes out of range; the
            # duplicated block is fully masked out inside the kernel.
            return (jnp.minimum(p * blocks_per_core + j, n_blocks - 1), 0)
    else:
        def in_map(p, j):
            return (p * blocks_per_core + j, 0)

    kernel = functools.partial(
        _sumsq_kernel,
        tile_m=tile_m,
        rows=rows,
        blocks_per_core=blocks_per_core,
        needs_mask=needs_mask,
    )

    cost = pl.CostEstimate(
        flops=3 * total,
        transcendentals=0,
        bytes_accessed=total * (jnp.dtype(yhat.dtype).itemsize
                                + jnp.dtype(y.dtype).itemsize) + 4 * n_par,
    )

    partials = pl.pallas_call(
        kernel,
        out_shape=jax.ShapeDtypeStruct((n_par, 1), jnp.float32),
        grid=(n_par, blocks_per_core),
        in_specs=[
            pl.BlockSpec((tile_m, _LANES), in_map),
            pl.BlockSpec((tile_m, _LANES), in_map),
        ],
        out_specs=pl.BlockSpec((1, 1), lambda p, j: (p, 0),
                               memory_space=pltpu.SMEM),
        scratch_shapes=[pltpu.VMEM((8, _LANES), jnp.float32)],
        compiler_params=pltpu.CompilerParams(
            dimension_semantics=("parallel", "arbitrary"),
            vmem_limit_bytes=_VMEM_LIMIT_BYTES),
        cost_estimate=cost,
    )(yh2, yy2)

    # Combine per-core partial sums; divide / +eps / sqrt are trivial scalars.
    sum_sq = jnp.sum(partials)
    return jnp.sqrt(sum_sq / jnp.float32(total) + jnp.float32(eps))


if __name__ == "__main__":
    key = jax.random.PRNGKey(0)

    # Primary small test, consistent with the module's forward
    # (it only requires yhat and y of matching shape).
    k1, k2 = jax.random.split(key)
    shape = (2, 4, 16, 16)  # batch=2, channels=4, spatial=16x16
    yhat = jax.random.normal(k1, shape, dtype=jnp.float32)
    y = jax.random.normal(k2, shape, dtype=jnp.float32)

    loss = jax.block_until_ready(rmse_loss(yhat, y, eps=1e-6))
    ref = jnp.sqrt(jnp.mean((yhat - y) ** 2) + 1e-6)
    assert jnp.allclose(loss, ref, rtol=1e-5, atol=1e-6), (loss, ref)

    # Secondary test: exercises multi-block tiling, the ragged-row mask and
    # (on dual-TensorCore chips) the per-core partial-sum path.
    k3, k4 = jax.random.split(k2)
    shape2 = (2, 4, 260, 256)
    yhat2 = jax.random.normal(k3, shape2, dtype=jnp.float32)
    y2 = jax.random.normal(k4, shape2, dtype=jnp.float32)

    loss2 = jax.block_until_ready(rmse_loss(yhat2, y2, eps=1e-6))
    ref2 = jnp.sqrt(jnp.mean((yhat2 - y2) ** 2) + 1e-6)
    assert jnp.allclose(loss2, ref2, rtol=1e-5, atol=1e-6), (loss2, ref2)

    print("KERNEL_OK")
</pallas_src>

<mosaic_0001>
module attributes {stable_mosaic.version = 11 : i64} {
  func.func @_sumsq_kernel(%arg0: i32, %arg1: i32, %arg2: memref<16x128xf32, #tpu.memory_space<vmem>>, %arg3: memref<16x128xf32, #tpu.memory_space<vmem>>, %arg4: memref<1x1xf32, #tpu.memory_space<smem>>, %arg5: memref<8x128xf32, #tpu.memory_space<vmem>>) attributes {dimension_semantics = [#tpu.dimension_semantics<parallel>, #tpu.dimension_semantics<arbitrary>], iteration_bounds = array<i64: 1, 1>, scalar_prefetch = 0 : i64, scratch_operands = 1 : i64, tpu.core_type = #tpu.core_type<tc>, window_params = [{transform_indices = @transform_0, window_bounds = array<i64: 16, 128>}, {transform_indices = @transform_1, window_bounds = array<i64: 16, 128>}, {transform_indices = @transform_2, window_bounds = array<i64: 1, 1>}]} {
    %c0_i32 = arith.constant 0 : i32
    %0 = arith.cmpi eq, %arg1, %c0_i32 : i32
    %1 = arith.extui %0 : i1 to i32
    %c0_i32_0 = arith.constant 0 : i32
    %2 = arith.cmpi ne, %1, %c0_i32_0 : i32
    scf.if %2 {
      %cst_10 = arith.constant 0.000000e+00 : f32
      %15 = vector.broadcast %cst_10 : f32 to vector<8x128xf32>
      %c0_11 = arith.constant 0 : index
      %c0_12 = arith.constant 0 : index
      %16 = vector.load %arg5[%c0_11, %c0_12] : memref<8x128xf32, #tpu.memory_space<vmem>>, vector<8x128xf32>
      tpu.vector_store %arg5[%c0_11, %c0_12], %15 {strides = array<i32>} : memref<8x128xf32, #tpu.memory_space<vmem>>, vector<8x128xf32>,
    } else {
    }
    %c0 = arith.constant 0 : index
    %c0_1 = arith.constant 0 : index
    %3 = vector.load %arg2[%c0, %c0_1] : memref<16x128xf32, #tpu.memory_space<vmem>>, vector<16x128xf32>
    %c0_2 = arith.constant 0 : index
    %c0_3 = arith.constant 0 : index
    %4 = vector.load %arg3[%c0_2, %c0_3] : memref<16x128xf32, #tpu.memory_space<vmem>>, vector<16x128xf32>
    %5 = arith.subf %3, %4 : vector<16x128xf32>
    %6 = arith.mulf %5, %5 : vector<16x128xf32>
    %c0_4 = arith.constant 0 : index
    %c0_5 = arith.constant 0 : index
    %7 = vector.load %arg5[%c0_4, %c0_5] : memref<8x128xf32, #tpu.memory_space<vmem>>, vector<8x128xf32>
    %8 = vector.shape_cast %6 : vector<16x128xf32> to vector<2x8x128xf32>
    %cst = arith.constant dense<0.000000e+00> : vector<8x128xf32>
    %9 = vector.multi_reduction <add>, %8, %cst [0] : vector<2x8x128xf32> to vector<8x128xf32>
    %10 = arith.addf %7, %9 : vector<8x128xf32>
    %c0_6 = arith.constant 0 : index
    %c0_7 = arith.constant 0 : index
    %11 = vector.load %arg5[%c0_6, %c0_7] : memref<8x128xf32, #tpu.memory_space<vmem>>, vector<8x128xf32>
    tpu.vector_store %arg5[%c0_6, %c0_7], %10 {strides = array<i32>} : memref<8x128xf32, #tpu.memory_space<vmem>>, vector<8x128xf32>,
    %c0_i32_8 = arith.constant 0 : i32
    %12 = arith.cmpi eq, %arg1, %c0_i32_8 : i32
    %13 = arith.extui %12 : i1 to i32
    %c0_i32_9 = arith.constant 0 : i32
    %14 = arith.cmpi ne, %13, %c0_i32_9 : i32
    scf.if %14 {
      %c0_10 = arith.constant 0 : index
      %c0_11 = arith.constant 0 : index
      %15 = vector.load %arg5[%c0_10, %c0_11] : memref<8x128xf32, #tpu.memory_space<vmem>>, vector<8x128xf32>
      %16 = vector.shape_cast %15 : vector<8x128xf32> to vector<1x8x128xf32>
      %cst_12 = arith.constant dense<0.000000e+00> : vector<1xf32>
      %17 = vector.multi_reduction <add>, %16, %cst_12 [1, 2] : vector<1x8x128xf32> to vector<1xf32>
      %18 = vector.shape_cast %17 : vector<1xf32> to vector<1x1x1xf32>
      %19 = vector.extract %18[0, 0, 0] : f32 from vector<1x1x1xf32>
      %c0_13 = arith.constant 0 : index
      %c0_14 = arith.constant 0 : index
      %20 = memref.load %arg4[%c0_13, %c0_14] : memref<1x1xf32, #tpu.memory_space<smem>>
      memref.store %19, %arg4[%c0_13, %c0_14] : memref<1x1xf32, #tpu.memory_space<smem>>
    } else {
    }
    return
  }
  func.func @transform_0(%arg0: i32, %arg1: i32) -> (i32, i32) {
    %c1_i32 = arith.constant 1 : i32
    %0 = arith.muli %arg0, %c1_i32 : i32
    %1 = arith.addi %0, %arg1 : i32
    %c0_i32 = arith.constant 0 : i32
    %c0_i32_0 = arith.constant 0 : i32
    return %1, %c0_i32 : i32, i32
  }
  func.func @transform_1(%arg0: i32, %arg1: i32) -> (i32, i32) {
    %c1_i32 = arith.constant 1 : i32
    %0 = arith.muli %arg0, %c1_i32 : i32
    %1 = arith.addi %0, %arg1 : i32
    %c0_i32 = arith.constant 0 : i32
    %c0_i32_0 = arith.constant 0 : i32
    return %1, %c0_i32 : i32, i32
  }
  func.func @transform_2(%arg0: i32, %arg1: i32) -> (i32, i32) {
    %c0_i32 = arith.constant 0 : i32
    %c0_i32_0 = arith.constant 0 : i32
    return %arg0, %c0_i32 : i32, i32
  }
}

</mosaic_0001>

<bundles_post_ra>
// kernel: tpu_custom_call.1
= control target key start
LH: loop header
LB: loop body
LE: loop exit
PB: predicated region body
PF: predicated region fallthrough
CT: control target
= control target key end

     0   :  { %7 = vsyncpa [#allocation4], 0  ;;  %s222_s0 = inlined_call_operand.hbm [shape: f32[16,128], index: 0, kind: input, shape index: {}]   ;;  %s223_s1 = inlined_call_operand.hbm [shape: f32[16,128], index: 1, kind: input, shape index: {}]   ;;  %s224_s2 = inlined_call_operand.hbm [shape: f32[1,1], index: 2, kind: output, shape index: {}]  }
   0x1   :  { %8 = vsyncpa [#allocation7], 0 }
   0x2   :  { %9 = vsyncpa [#allocation5], 0  ;;  %s166_s9 = smov [#allocation3]   ;;  %s106_s13 = scalar_lea.hbm %s222_s0, 256 }
   0x3   :  { %s19_s10 = sshll.u32 %s166_s9, 4  ;;  %p107_p0 = scmp.ne.s32.totalorder %s222_s0, %s106_s13  ;;  %s20_s10 = int_to_ptr.vmem [resolvable:$true] %s19_s10 }
   0x4   :  { %p110_p1 = scmp.lt.u32.totalorder %s106_s13, %s222_s0 }
   0x6   :  { %p112_p2 = pnand %p110_p1, %p107_p0 }
   0x8   :  { %115 = shalt.err (!%p112_p2)
}
   0x9   :  { %s116_s18 = scalar_lea.vmem %s20_s10, 256  ;;  %p121_p4 = scmp.lt.s32.totalorder %s20_s10, %s20_s10 }
   0xa   :  { %p117_p3 = scmp.ne.s32.totalorder %s20_s10, %s116_s18  ;;  %p122_p5 = scmp.lt.s32.totalorder %s116_s18, %s116_s18 }
   0xc   :  { %p123_p6 = por %p122_p5, %p121_p4 }
   0xe   :  { %p124_p7 = pnand %p123_p6, %p117_p3 }
  0x10   :  { %127 = shalt.err (!%p124_p7)
}
  0x11   :  { %s167_s19 = smov 128   ;;  %s168_s20 = smov 8  }
  0x12   :  { %25 = dma.hbm_to_vmem [thread:$0]  %s222_s0, 256, %s20_s10, [#allocation4], %s167_s19, %s167_s19, %s168_s20  }
  0x13   :  { %s169_s23 = smov [#allocation6]   ;;  %s128_s27 = scalar_lea.hbm %s223_s1, 256 }
  0x14   :  { %s35_s24 = sshll.u32 %s169_s23, 4  ;;  %p129_p8 = scmp.ne.s32.totalorder %s223_s1, %s128_s27  ;;  %s36_s24 = int_to_ptr.vmem [resolvable:$true] %s35_s24 }
  0x15   :  { %p132_p9 = scmp.lt.u32.totalorder %s128_s27, %s223_s1 }
  0x17   :  { %p134_p10 = pnand %p132_p9, %p129_p8 }
  0x19   :  { %137 = shalt.err (!%p134_p10)
}
  0x1a   :  { %s138_s4 = scalar_lea.vmem %s36_s24, 256  ;;  %p143_p12 = scmp.lt.s32.totalorder %s36_s24, %s36_s24 }
  0x1b   :  { %p139_p11 = scmp.ne.s32.totalorder %s36_s24, %s138_s4  ;;  %p144_p13 = scmp.lt.s32.totalorder %s138_s4, %s138_s4 }
  0x1d   :  { %p145_p0 = por %p144_p13, %p143_p12 }
  0x1f   :  { %p146_p1 = pnand %p145_p0, %p139_p11 }
  0x21   :  { %149 = shalt.err (!%p146_p1)
}
  0x22   :  { %41 = dma.hbm_to_vmem [thread:$0]  %s223_s1, 256, %s36_s24, [#allocation7], %s167_s19, %s167_s19, %s168_s20  }
  0x23   :  { %160 = dma.done.wait [#allocation4], 256  }
  0x24   :  { %161 = vsyncadd [#allocation4], 4294967040 }
  0x25   :  { %162 = dma.done.wait [#allocation7], 256  }
  0x26   :  { %163 = vsyncadd [#allocation7], 4294967040  ;;  %v57_v0 = vld [vmem:[#allocation3] sm:$0xff]  ;;  %v58_v1 = vld [vmem:[#allocation3 + $0x8] sm:$0xff]  ;;  %s150_s8 = scalar_lea.hbm %s224_s2, 16 }
  0x27   :  { %v59_v2 = vld [vmem:[#allocation6] sm:$0xff]  ;;  %v60_v3 = vld [vmem:[#allocation6 + $0x8] sm:$0xff]  ;;  %p151_p2 = scmp.ne.s32.totalorder %s224_s2, %s150_s8  ;;  %p154_p3 = scmp.lt.u32.totalorder %s150_s8, %s224_s2 }
  0x28   :  { %v61_v4 = vsub.f32 %v57_v0, %v59_v2  ;;  %v62_v5 = vsub.f32 %v58_v1, %v60_v3 }
  0x29   :  { %p156_p4 = pnand %p154_p3, %p151_p2 }
  0x2a   :  { %v63_v6 = vmul.f32 %v61_v4, %v61_v4  ;;  %v64_v7 = vmul.f32 %v62_v5, %v62_v5 }
  0x2c   :  { %v66_v8 = vadd.f32 %v64_v7, %v63_v6 }
  0x2e   :  { %73 = vadd.xlane.f32.xlu0 %v66_v8 }
  0xbb   :  { %v74_v9 = vpop.xlane.xlu0 %73 }
  0xbc   :  { %v75_v10 = vrot.slane %v74_v9, 4 }
  0xbe   :  { %v76_v11 = vadd.f32 %v75_v10, %v74_v9 }
  0xc0   :  { %v77_v12 = vrot.slane %v76_v11, 2 }
  0xc2   :  { %v78_v13 = vadd.f32 %v77_v12, %v76_v11 }
  0xc4   :  { %v79_v14 = vrot.slane %v78_v13, 1 }
  0xc6   :  { %v80_v15 = vadd.f32 %v79_v14, %v78_v13 }
  0xc8   :  { %99 = vpush %v80_v15 }
  0xf9   :  { %s100_s1 = spop %99 }
  0xfa   :  { %83 = sst [smem:[#allocation8]] %s100_s1 }
  0xfb   :  { %159 = shalt.err (!%p156_p4)
}
  0xfc   :  { %s170_s13 = smov [#allocation8]  }
  0xfd   :  { %91 = dma.smem_to_hbm %s170_s13, 16, %s224_s2, [#allocation5]  }
  0xfe   :  { %164 = dma.done.wait [#allocation5], 16  }
  0xff   :  { %165 = vsyncadd [#allocation5], 4294967280 }
 0x100   :  { %95 = sfence }
 0x101   :  { %96 = vsyncpa [#allocation4], 1 }
 0x102   :  { %97 = vsyncpa [#allocation7], 1 }
 0x103   :  { %98 = vsyncpa [#allocation5], 1 }

</bundles_post_ra>
